<compile_context>
chip_gen: v7x
topology: tpu7x:2x2x1
jax: 0.10.0
libtpu: 0.0.40
codegen_flags: <defaults>
</compile_context>

<pallas_src>
import math
from functools import partial

import jax
import jax.numpy as jnp
from jax.experimental import pallas as pl
from jax.experimental.pallas import tpu as pltpu


# ----------------------------------------------------------------------------
# Kernel A: fused QKV projection (activation read once, three outputs).
# The V output already includes the out-projection (W_v @ W_o) and its bias.
# ----------------------------------------------------------------------------

def _qkv_proj_kernel(x_ref, wq_ref, wk_ref, wv_ref, bq_ref, bk_ref, bv_ref,
                     q_ref, k_ref, v_ref):
    x = x_ref[...].astype(jnp.bfloat16)
    q = jnp.dot(x, wq_ref[...], preferred_element_type=jnp.float32) + bq_ref[...]
    k = jnp.dot(x, wk_ref[...], preferred_element_type=jnp.float32) + bk_ref[...]
    v = jnp.dot(x, wv_ref[...], preferred_element_type=jnp.float32) + bv_ref[...]
    q_ref[...] = q.astype(q_ref.dtype)
    k_ref[...] = k.astype(k_ref.dtype)
    v_ref[...] = v.astype(v_ref.dtype)


def qkv_proj(x_flat, wq, wk, wvo, bq, bk, bvo, *, tm=256):
    """x_flat: (M, D) f32 -> (q, k, v') each (M, D) bf16."""
    M, D = x_flat.shape
    TM = M if M <= tm else tm               # full dim or multiple of 8/16
    grid = (pl.cdiv(M, TM),)
    bf = jnp.bfloat16
    out_sd = jax.ShapeDtypeStruct((M, D), bf)
    row_spec = pl.BlockSpec((TM, D), lambda i: (i, 0))
    w_spec = pl.BlockSpec((D, D), lambda i: (0, 0))
    b_spec = pl.BlockSpec((1, D), lambda i: (0, 0))
    return pl.pallas_call(
        _qkv_proj_kernel,
        out_shape=(out_sd, out_sd, out_sd),
        grid=grid,
        in_specs=[row_spec, w_spec, w_spec, w_spec, b_spec, b_spec, b_spec],
        out_specs=(row_spec, row_spec, row_spec),
        compiler_params=pltpu.CompilerParams(
            dimension_semantics=("parallel",)),
    )(x_flat, wq.astype(bf), wk.astype(bf), wvo.astype(bf),
      bq.reshape(1, D), bk.reshape(1, D), bvo.reshape(1, D))


# ----------------------------------------------------------------------------
# Kernel B: batched attention core + residual + layernorm epilogue.
# Attention probabilities are NOT written to HBM (encode() discards them).
# ----------------------------------------------------------------------------

def _attn_res_ln_kernel(q_ref, k_ref, v_ref, x_ref, m_ref, g_ref, b_ref,
                        o_ref, *, scale):
    # q/k/v: (NB, L, D) bf16; x: (NB, L, D) f32 residual; m: (L, L) additive.
    s = jnp.einsum("bqd,bkd->bqk", q_ref[...], k_ref[...],
                   preferred_element_type=jnp.float32) * scale
    s = s + m_ref[...]                               # broadcast (L,L)->(NB,L,L)
    s_max = jnp.max(s, axis=-1, keepdims=True)
    p = jnp.exp(s - s_max)
    denom = jnp.sum(p, axis=-1, keepdims=True)
    p = p * pl.reciprocal(denom, approx=True)
    ctx = jnp.einsum("bqk,bkd->bqd", p.astype(jnp.bfloat16), v_ref[...],
                     preferred_element_type=jnp.float32)
    r = x_ref[...].astype(jnp.float32) + ctx          # residual (out-proj folded)
    mu = jnp.mean(r, axis=-1, keepdims=True)
    var = jnp.mean((r - mu) * (r - mu), axis=-1, keepdims=True)
    y = (r - mu) * jax.lax.rsqrt(var + 1e-5)
    o_ref[...] = (y * g_ref[...] + b_ref[...]).astype(o_ref.dtype)


def attn_res_ln(q, k, v, x_res, mask, gamma, beta, *, nb=128):
    """q/k/v: (N, L, D) bf16; x_res: (N, L, D) f32; mask: (L, L) additive."""
    N, L, D = q.shape
    NB = N if N <= nb else nb
    grid = (pl.cdiv(N, NB),)
    seq_spec = pl.BlockSpec((NB, L, D), lambda i: (i, 0, 0))
    scale = 1.0 / math.sqrt(D)
    return pl.pallas_call(
        partial(_attn_res_ln_kernel, scale=scale),
        out_shape=jax.ShapeDtypeStruct((N, L, D), x_res.dtype),
        grid=grid,
        in_specs=[
            seq_spec, seq_spec, seq_spec, seq_spec,
            pl.BlockSpec((L, L), lambda i: (0, 0)),
            pl.BlockSpec((1, D), lambda i: (0, 0)),
            pl.BlockSpec((1, D), lambda i: (0, 0)),
        ],
        out_specs=seq_spec,
        compiler_params=pltpu.CompilerParams(
            dimension_semantics=("parallel",)),
    )(q, k, v, x_res, mask, gamma.reshape(1, D), beta.reshape(1, D))


# ----------------------------------------------------------------------------
# Kernel C: fused FFN (relu MLP) + residual + layernorm epilogue.
# ----------------------------------------------------------------------------

def _ffn_res_ln_kernel(x_ref, w1_ref, b1_ref, w2_ref, b2_ref, g_ref, be_ref,
                       o_ref):
    x = x_ref[...].astype(jnp.float32)
    h = jnp.dot(x.astype(jnp.bfloat16), w1_ref[...],
                preferred_element_type=jnp.float32) + b1_ref[...]
    h = jnp.maximum(h, 0.0)
    y = jnp.dot(h.astype(jnp.bfloat16), w2_ref[...],
                preferred_element_type=jnp.float32) + b2_ref[...]
    r = x + y
    mu = jnp.mean(r, axis=-1, keepdims=True)
    var = jnp.mean((r - mu) * (r - mu), axis=-1, keepdims=True)
    yn = (r - mu) * jax.lax.rsqrt(var + 1e-5)
    o_ref[...] = (yn * g_ref[...] + be_ref[...]).astype(o_ref.dtype)


def ffn_res_ln(x_flat, w1, b1, w2, b2, gamma, beta, *, tm=256):
    M, D = x_flat.shape
    H = w1.shape[1]
    TM = M if M <= tm else tm
    grid = (pl.cdiv(M, TM),)
    bf = jnp.bfloat16
    row_spec = pl.BlockSpec((TM, D), lambda i: (i, 0))
    return pl.pallas_call(
        _ffn_res_ln_kernel,
        out_shape=jax.ShapeDtypeStruct((M, D), x_flat.dtype),
        grid=grid,
        in_specs=[
            row_spec,
            pl.BlockSpec((D, H), lambda i: (0, 0)),
            pl.BlockSpec((1, H), lambda i: (0, 0)),
            pl.BlockSpec((H, D), lambda i: (0, 0)),
            pl.BlockSpec((1, D), lambda i: (0, 0)),
            pl.BlockSpec((1, D), lambda i: (0, 0)),
            pl.BlockSpec((1, D), lambda i: (0, 0)),
        ],
        out_specs=row_spec,
        compiler_params=pltpu.CompilerParams(
            dimension_semantics=("parallel",)),
    )(x_flat, w1.astype(bf), b1.reshape(1, H), w2.astype(bf),
      b2.reshape(1, D), gamma.reshape(1, D), beta.reshape(1, D))


# ----------------------------------------------------------------------------
# Encoder layer + PixelNet.encode (glue in plain JAX)
# ----------------------------------------------------------------------------

def init_layer_params(key, d_model, d_ff, dtype=jnp.float32):
    ks = jax.random.split(key, 10)
    std = 0.02

    def lin(k, din, dout):
        return (jax.random.normal(k, (din, dout), dtype) * std,
                jnp.zeros((dout,), dtype))

    p = {}
    p["t_wq"], p["t_bq"] = lin(ks[0], d_model, d_model)
    p["t_wk"], p["t_bk"] = lin(ks[1], d_model, d_model)
    p["t_wv"], p["t_bv"] = lin(ks[2], d_model, d_model)
    p["t_wo"], p["t_bo"] = lin(ks[3], d_model, d_model)
    p["s_wq"], p["s_bq"] = lin(ks[4], d_model, d_model)
    p["s_wk"], p["s_bk"] = lin(ks[5], d_model, d_model)
    p["s_wv"], p["s_bv"] = lin(ks[6], d_model, d_model)
    p["s_wo"], p["s_bo"] = lin(ks[7], d_model, d_model)
    p["f_w1"], p["f_b1"] = lin(ks[8], d_model, d_ff)
    p["f_w2"], p["f_b2"] = lin(ks[9], d_ff, d_model)
    for n in ("ln1", "ln2", "ln3"):
        p[n + "_g"] = jnp.ones((d_model,), dtype)
        p[n + "_b"] = jnp.zeros((d_model,), dtype)
    return p


def encoder_layer(x, params, src_mask, space_mask):
    """One spatio-temporal encoder layer.

    x: [B, T, S, D]; src_mask: [T, T]; space_mask: [S, S] (additive masks).
    Returns (output [B,T,S,D], None, None): attention maps are intentionally
    not materialized because encode() discards them (perf review).
    """
    B, T, S, D = x.shape
    p = params

    # --- temporal self-attention (attend over T for each spatial position) ---
    xt = jnp.transpose(x, (0, 2, 1, 3))                     # [B, S, T, D]
    flat = xt.reshape(B * S * T, D)
    wvo = p["t_wv"] @ p["t_wo"]                             # fold out-projection
    bvo = p["t_bv"] @ p["t_wo"] + p["t_bo"]
    q, k, v = qkv_proj(flat, p["t_wq"], p["t_wk"], wvo, p["t_bq"], p["t_bk"], bvo)
    q = q.reshape(B * S, T, D)
    k = k.reshape(B * S, T, D)
    v = v.reshape(B * S, T, D)
    yt = attn_res_ln(q, k, v, xt.reshape(B * S, T, D), src_mask,
                     p["ln1_g"], p["ln1_b"])
    x = jnp.transpose(yt.reshape(B, S, T, D), (0, 2, 1, 3))  # back to [B,T,S,D]

    # --- spatial self-attention (attend over S for each time step) ---
    xs = x.reshape(B * T, S, D)
    flat = x.reshape(B * T * S, D)
    wvo = p["s_wv"] @ p["s_wo"]
    bvo = p["s_bv"] @ p["s_wo"] + p["s_bo"]
    q, k, v = qkv_proj(flat, p["s_wq"], p["s_wk"], wvo, p["s_bq"], p["s_bk"], bvo)
    q = q.reshape(B * T, S, D)
    k = k.reshape(B * T, S, D)
    v = v.reshape(B * T, S, D)
    ys = attn_res_ln(q, k, v, xs, space_mask, p["ln2_g"], p["ln2_b"])
    x = ys.reshape(B, T, S, D)

    # --- feed-forward + residual + layernorm (single fused kernel) ---
    out = ffn_res_ln(x.reshape(B * T * S, D), p["f_w1"], p["f_b1"],
                     p["f_w2"], p["f_b2"], p["ln3_g"], p["ln3_b"])
    x = out.reshape(B, T, S, D)

    # TODO(synk): a debug variant can additionally return tp_attn/sp_attn; the
    # encode() path never uses them, so they are not written to HBM here.
    return x, None, None


class PixelNet:
    """JAX/Pallas port of PixelNet: concrete `encode` path.

    forward() is abstract in the reference module.
    # TODO(synk): sample()/generate() rely on an undefined forward() and on
    # attributes (self.n_e, self.embedding) never set in __init__; not ported.
    """

    def __init__(self, layer_params_list, sample_method="sample"):
        self.encoder_layers = layer_params_list
        self.sample_method = sample_method

    def encode(self, x, src_mask, space_mask):
        output = x
        for layer_p in self.encoder_layers:
            output, tp_attn, sp_attn = encoder_layer(
                output, layer_p, src_mask, space_mask)
        return output


# ----------------------------------------------------------------------------
# Main
# ----------------------------------------------------------------------------

if __name__ == "__main__":
    B, T, S, D = 2, 4, 8, 32
    D_FF = 64
    N_LAYERS = 2

    key = jax.random.PRNGKey(0)
    k_x, *k_layers = jax.random.split(key, 1 + N_LAYERS)

    x = jax.random.normal(k_x, (B, T, S, D), jnp.float32)

    # causal additive mask over time; no masking over space
    neg = jnp.float32(-1e9)
    src_mask = jnp.where(
        jnp.tril(jnp.ones((T, T), jnp.bool_)), 0.0, neg).astype(jnp.float32)
    space_mask = jnp.zeros((S, S), jnp.float32)

    layer_params = [init_layer_params(k, D, D_FF) for k in k_layers]
    net = PixelNet(layer_params)

    out = net.encode(x, src_mask, space_mask)
    out = jax.block_until_ready(out)

    assert out.shape == (B, T, S, D)
    assert bool(jnp.all(jnp.isfinite(out)))
    print("KERNEL_OK")
</pallas_src>

<mosaic_0001>
module attributes {stable_mosaic.version = 11 : i64} {
  func.func @_qkv_proj_kernel(%arg0: i32, %arg1: memref<64x32xf32, #tpu.memory_space<vmem>>, %arg2: memref<32x32xbf16, #tpu.memory_space<vmem>>, %arg3: memref<32x32xbf16, #tpu.memory_space<vmem>>, %arg4: memref<32x32xbf16, #tpu.memory_space<vmem>>, %arg5: memref<1x32xf32, #tpu.memory_space<vmem>>, %arg6: memref<1x32xf32, #tpu.memory_space<vmem>>, %arg7: memref<1x32xf32, #tpu.memory_space<vmem>>, %arg8: memref<64x32xbf16, #tpu.memory_space<vmem>>, %arg9: memref<64x32xbf16, #tpu.memory_space<vmem>>, %arg10: memref<64x32xbf16, #tpu.memory_space<vmem>>) attributes {dimension_semantics = [#tpu.dimension_semantics<parallel>], iteration_bounds = array<i64: 1>, scalar_prefetch = 0 : i64, scratch_operands = 0 : i64, tpu.core_type = #tpu.core_type<tc>, window_params = [{transform_indices = @transform_0, window_bounds = array<i64: 64, 32>}, {pipeline_mode = #tpu.pipeline_mode<synchronous>, transform_indices = @transform_1, window_bounds = array<i64: 32, 32>}, {pipeline_mode = #tpu.pipeline_mode<synchronous>, transform_indices = @transform_2, window_bounds = array<i64: 32, 32>}, {pipeline_mode = #tpu.pipeline_mode<synchronous>, transform_indices = @transform_3, window_bounds = array<i64: 32, 32>}, {pipeline_mode = #tpu.pipeline_mode<synchronous>, transform_indices = @transform_4, window_bounds = array<i64: 1, 32>}, {pipeline_mode = #tpu.pipeline_mode<synchronous>, transform_indices = @transform_5, window_bounds = array<i64: 1, 32>}, {pipeline_mode = #tpu.pipeline_mode<synchronous>, transform_indices = @transform_6, window_bounds = array<i64: 1, 32>}, {transform_indices = @transform_7, window_bounds = array<i64: 64, 32>}, {transform_indices = @transform_8, window_bounds = array<i64: 64, 32>}, {transform_indices = @transform_9, window_bounds = array<i64: 64, 32>}]} {
    %c0 = arith.constant 0 : index
    %c0_0 = arith.constant 0 : index
    %0 = vector.load %arg1[%c0, %c0_0] : memref<64x32xf32, #tpu.memory_space<vmem>>, vector<64x32xf32>
    %1 = arith.truncf %0 : vector<64x32xf32> to vector<64x32xbf16>
    %c0_1 = arith.constant 0 : index
    %c0_2 = arith.constant 0 : index
    %2 = vector.load %arg2[%c0_1, %c0_2] : memref<32x32xbf16, #tpu.memory_space<vmem>>, vector<32x32xbf16>
    %cst = arith.constant dense<0.000000e+00> : vector<64x32xf32>
    %3 = tpu.matmul %1, %2, %cst {dimension_numbers = #tpu.dot_dimension_numbers<[1], [0], [0], [1], [0, 0, 1, 1], [], []>} : vector<64x32xbf16>, vector<32x32xbf16>, vector<64x32xf32> -> vector<64x32xf32>
    %c0_3 = arith.constant 0 : index
    %c0_4 = arith.constant 0 : index
    %4 = vector.load %arg5[%c0_3, %c0_4] : memref<1x32xf32, #tpu.memory_space<vmem>>, vector<1x32xf32>
    %5 = vector.broadcast %4 : vector<1x32xf32> to vector<64x32xf32>
    %6 = arith.addf %3, %5 : vector<64x32xf32>
    %c0_5 = arith.constant 0 : index
    %c0_6 = arith.constant 0 : index
    %7 = vector.load %arg3[%c0_5, %c0_6] : memref<32x32xbf16, #tpu.memory_space<vmem>>, vector<32x32xbf16>
    %cst_7 = arith.constant dense<0.000000e+00> : vector<64x32xf32>
    %8 = tpu.matmul %1, %7, %cst_7 {dimension_numbers = #tpu.dot_dimension_numbers<[1], [0], [0], [1], [0, 0, 1, 1], [], []>} : vector<64x32xbf16>, vector<32x32xbf16>, vector<64x32xf32> -> vector<64x32xf32>
    %c0_8 = arith.constant 0 : index
    %c0_9 = arith.constant 0 : index
    %9 = vector.load %arg6[%c0_8, %c0_9] : memref<1x32xf32, #tpu.memory_space<vmem>>, vector<1x32xf32>
    %10 = vector.broadcast %9 : vector<1x32xf32> to vector<64x32xf32>
    %11 = arith.addf %8, %10 : vector<64x32xf32>
    %c0_10 = arith.constant 0 : index
    %c0_11 = arith.constant 0 : index
    %12 = vector.load %arg4[%c0_10, %c0_11] : memref<32x32xbf16, #tpu.memory_space<vmem>>, vector<32x32xbf16>
    %cst_12 = arith.constant dense<0.000000e+00> : vector<64x32xf32>
    %13 = tpu.matmul %1, %12, %cst_12 {dimension_numbers = #tpu.dot_dimension_numbers<[1], [0], [0], [1], [0, 0, 1, 1], [], []>} : vector<64x32xbf16>, vector<32x32xbf16>, vector<64x32xf32> -> vector<64x32xf32>
    %c0_13 = arith.constant 0 : index
    %c0_14 = arith.constant 0 : index
    %14 = vector.load %arg7[%c0_13, %c0_14] : memref<1x32xf32, #tpu.memory_space<vmem>>, vector<1x32xf32>
    %15 = vector.broadcast %14 : vector<1x32xf32> to vector<64x32xf32>
    %16 = arith.addf %13, %15 : vector<64x32xf32>
    %17 = arith.truncf %6 : vector<64x32xf32> to vector<64x32xbf16>
    %c0_15 = arith.constant 0 : index
    %c0_16 = arith.constant 0 : index
    %18 = vector.load %arg8[%c0_15, %c0_16] : memref<64x32xbf16, #tpu.memory_space<vmem>>, vector<64x32xbf16>
    tpu.vector_store %arg8[%c0_15, %c0_16], %17 {strides = array<i32>} : memref<64x32xbf16, #tpu.memory_space<vmem>>, vector<64x32xbf16>,
    %19 = arith.truncf %11 : vector<64x32xf32> to vector<64x32xbf16>
    %c0_17 = arith.constant 0 : index
    %c0_18 = arith.constant 0 : index
    %20 = vector.load %arg9[%c0_17, %c0_18] : memref<64x32xbf16, #tpu.memory_space<vmem>>, vector<64x32xbf16>
    tpu.vector_store %arg9[%c0_17, %c0_18], %19 {strides = array<i32>} : memref<64x32xbf16, #tpu.memory_space<vmem>>, vector<64x32xbf16>,
    %21 = arith.truncf %16 : vector<64x32xf32> to vector<64x32xbf16>
    %c0_19 = arith.constant 0 : index
    %c0_20 = arith.constant 0 : index
    %22 = vector.load %arg10[%c0_19, %c0_20] : memref<64x32xbf16, #tpu.memory_space<vmem>>, vector<64x32xbf16>
    tpu.vector_store %arg10[%c0_19, %c0_20], %21 {strides = array<i32>} : memref<64x32xbf16, #tpu.memory_space<vmem>>, vector<64x32xbf16>,
    return
  }
  func.func @transform_0(%arg0: i32) -> (i32, i32) {
    %c0_i32 = arith.constant 0 : i32
    %c0_i32_0 = arith.constant 0 : i32
    return %arg0, %c0_i32 : i32, i32
  }
  func.func @transform_1(%arg0: i32) -> (i32, i32) {
    %c0_i32 = arith.constant 0 : i32
    %c0_i32_0 = arith.constant 0 : i32
    %c0_i32_1 = arith.constant 0 : i32
    return %c0_i32, %c0_i32_0 : i32, i32
  }
  func.func @transform_2(%arg0: i32) -> (i32, i32) {
    %c0_i32 = arith.constant 0 : i32
    %c0_i32_0 = arith.constant 0 : i32
    %c0_i32_1 = arith.constant 0 : i32
    return %c0_i32, %c0_i32_0 : i32, i32
  }
  func.func @transform_3(%arg0: i32) -> (i32, i32) {
    %c0_i32 = arith.constant 0 : i32
    %c0_i32_0 = arith.constant 0 : i32
    %c0_i32_1 = arith.constant 0 : i32
    return %c0_i32, %c0_i32_0 : i32, i32
  }
  func.func @transform_4(%arg0: i32) -> (i32, i32) {
    %c0_i32 = arith.constant 0 : i32
    %c0_i32_0 = arith.constant 0 : i32
    %c0_i32_1 = arith.constant 0 : i32
    return %c0_i32, %c0_i32_0 : i32, i32
  }
  func.func @transform_5(%arg0: i32) -> (i32, i32) {
    %c0_i32 = arith.constant 0 : i32
    %c0_i32_0 = arith.constant 0 : i32
    %c0_i32_1 = arith.constant 0 : i32
    return %c0_i32, %c0_i32_0 : i32, i32
  }
  func.func @transform_6(%arg0: i32) -> (i32, i32) {
    %c0_i32 = arith.constant 0 : i32
    %c0_i32_0 = arith.constant 0 : i32
    %c0_i32_1 = arith.constant 0 : i32
    return %c0_i32, %c0_i32_0 : i32, i32
  }
  func.func @transform_7(%arg0: i32) -> (i32, i32) {
    %c0_i32 = arith.constant 0 : i32
    %c0_i32_0 = arith.constant 0 : i32
    return %arg0, %c0_i32 : i32, i32
  }
  func.func @transform_8(%arg0: i32) -> (i32, i32) {
    %c0_i32 = arith.constant 0 : i32
    %c0_i32_0 = arith.constant 0 : i32
    return %arg0, %c0_i32 : i32, i32
  }
  func.func @transform_9(%arg0: i32) -> (i32, i32) {
    %c0_i32 = arith.constant 0 : i32
    %c0_i32_0 = arith.constant 0 : i32
    return %arg0, %c0_i32 : i32, i32
  }
}

</mosaic_0001>

<bundles_post_ra>
// kernel: tpu_custom_call.1
= control target key start
LH: loop header
LB: loop body
LE: loop exit
PB: predicated region body
PF: predicated region fallthrough
CT: control target
= control target key end

     0   :  { %vm65_vm0 = vcmask 261120   ;;  %vm351_vm1 = vcmask 257024   ;;  %s794_s1 = inlined_call_operand.vmem [shape: bf16[32,32], index: 1, kind: input, shape index: {}]   ;;  %s795_s0 = inlined_call_operand.vmem [shape: f32[64,32], index: 0, kind: input, shape index: {}]   ;;  %s796_s2 = inlined_call_operand.vmem [shape: bf16[32,32], index: 2, kind: input, shape index: {}]   ;;  %s797_s3 = inlined_call_operand.vmem [shape: bf16[32,32], index: 3, kind: input, shape index: {}]   ;;  %s798_s4 = inlined_call_operand.vmem [shape: f32[1,32], index: 4, kind: input, shape index: {}]   ;;  %s799_s7 = inlined_call_operand.vmem [shape: bf16[64,32], index: 7, kind: output, shape index: {0}]   ;;  %s800_s5 = inlined_call_operand.vmem [shape: f32[1,32], index: 5, kind: input, shape index: {}]   ;;  %s801_s6 = inlined_call_operand.vmem [shape: f32[1,32], index: 6, kind: input, shape index: {}]   ;;  %s802_s8 = inlined_call_operand.vmem [shape: bf16[64,32], index: 8, kind: output, shape index: {1}]   ;;  %s803_s9 = inlined_call_operand.vmem [shape: bf16[64,32], index: 9, kind: output, shape index: {2}]  }
   0x1   :  { %v579_v0 = vld [vmem:[%s794_s1] sm:$0xff]   ;;  %v580_v1 = vld [vmem:[%s794_s1 + $0x8] sm:$0xff]   ;;  %v32_v7 = vld [vmem:[%s795_s0 + $0x10] sm:$0xff] }
   0x2   :  { %539 = vmatprep.subr.bf16.mxu0 %v579_v0  ;;  %575 = vmatprep.subr.bf16.mxu1 %v579_v0  ;;  %v30_v2 = vld [vmem:[%s795_s0] sm:$0xff]  ;;  %v31_v3 = vld [vmem:[%s795_s0 + $0x8] sm:$0xff]  ;;  %v33_v8 = vld [vmem:[%s795_s0 + $0x18] sm:$0xff] }
   0x3   :  { %v34_v4 = vld [vmem:[%s795_s0 + $0x20] sm:$0xff]  ;;  %540 = vmatpush3.bf16.msra.mxu0 %v579_v0  ;;  %577 = vmatpush3.bf16.msra.mxu1 %v579_v0  ;;  %v38_v5 = vpack.c.bf16 %v31_v3, %v30_v2  ;;  %v35_v6 = vld [vmem:[%s795_s0 + $0x28] sm:$0xff]  ;;  %v36_v10 = vld [vmem:[%s795_s0 + $0x30] sm:$0xff]  ;;  %v39_v13 = vpack.c.bf16 %v33_v8, %v32_v7 }
   0x4   :  { %541 = vmatprep.subr.bf16.mxu0 %v580_v1  ;;  %576 = vmatprep.subr.bf16.mxu1 %v580_v1  ;;  %v40_v9 = vpack.c.bf16 %v35_v6, %v34_v4  ;;  %v37_v11 = vld [vmem:[%s795_s0 + $0x38] sm:$0xff]  ;;  %v581_v12 = vld [vmem:[%s796_s2] sm:$0xff]   ;;  %v583_v16 = vld [vmem:[%s796_s2 + $0x8] sm:$0xff]  }
   0x5   :  { %543 = vmatprep.mubr.msk.bf16.mxu0 %vm65_vm0, %v38_v5  ;;  %v41_v14 = vpack.c.bf16 %v37_v11, %v36_v10  ;;  %v582_v15 = vld [vmem:[%s797_s3] sm:$0xff]   ;;  %v584_v17 = vld [vmem:[%s797_s3 + $0x8] sm:$0xff]  }
   0x6   :  { %547 = vmatprep.mubr.msk.bf16.mxu1 %vm65_vm0, %v40_v9  ;;  %v452_v18 = vld [vmem:[%s798_s4] ss:$0 sm:$0xff] }
   0x7   :  { %542 = vmatpush3.bf16.msra.mxu0 %v580_v1  ;;  %578 = vmatpush3.bf16.msra.mxu1 %v580_v1  ;;  %v459_v43 = vld [vmem:[%s800_s5] ss:$0 sm:$0xff] }
   0x8   :  { %551 = vmatprep.subr.bf16.mxu1 %v581_v12  ;;  %563 = vmatprep.subr.bf16.mxu0 %v582_v15  ;;  %v466_v44 = vld [vmem:[%s801_s6] ss:$0 sm:$0xff] }
   0xa   :  { %544 = vmatmul.mubr.msk.bf16.vlgmr.msra.gmra.mrb[0].mxu0 %vm65_vm0, %v39_v13  ;;  %548 = vmatmul.mubr.msk.bf16.vlgmr.msra.gmra.mrb[0].mxu1 %vm65_vm0, %v41_v14 }
   0xb   :  { %552 = vmatpush3.bf16.msra.mxu1 %v581_v12  ;;  %564 = vmatpush3.bf16.msra.mxu0 %v582_v15 }
   0xc   :  { %553 = vmatprep.subr.bf16.mxu1 %v583_v16  ;;  %565 = vmatprep.subr.bf16.mxu0 %v584_v17 }
   0xd   :  { %555 = vmatprep.mubr.msk.bf16.mxu1 %vm65_vm0, %v38_v5  ;;  %567 = vmatprep.mubr.msk.bf16.mxu0 %vm65_vm0, %v38_v5 }
   0xf   :  { %554 = vmatpush3.bf16.msra.mxu1 %v583_v16  ;;  %566 = vmatpush3.bf16.msra.mxu0 %v584_v17 }
  0x12   :  { %556 = vmatmul.mubr.msk.bf16.vlgmr.msra.gmra.mrb[4].mxu1 %vm65_vm0, %v39_v13  ;;  %568 = vmatmul.mubr.msk.bf16.vlgmr.msra.gmra.mrb[4].mxu0 %vm65_vm0, %v39_v13 }
  0x13   :  { %559 = vmatprep.mubr.msk.bf16.mxu1 %vm65_vm0, %v40_v9  ;;  %571 = vmatprep.mubr.msk.bf16.mxu0 %vm65_vm0, %v40_v9 }
  0x1a   :  { %560 = vmatmul.mubr.msk.bf16.gmra.mrb[8].mxu1 %vm65_vm0, %v41_v14  ;;  %572 = vmatmul.mubr.msk.bf16.gmra.mrb[8].mxu0 %vm65_vm0, %v41_v14 }
  0xdd   :  { %v545_v19 = vpop.f32.mrb[0].mxu0  ;;  %v549_v20 = vpop.f32.mrb[0].mxu1 }
  0xde   :  { %v121_v21 = vadd.f32 %v545_v19, %v452_v18  ;;  %v137_v22 = vadd.f32 %v549_v20, %v452_v18  ;;  %v112_v23 = vpop.f32.mrb[1].mxu0  ;;  %v128_v24 = vpop.f32.mrb[1].mxu1 }
  0xdf   :  { %v113_v25 = vadd.f32 %v452_v18, %v112_v23  ;;  %v129_v26 = vadd.f32 %v452_v18, %v128_v24  ;;  %v546_v27 = vpop.f32.mrb[2].mxu0  ;;  %v550_v28 = vpop.f32.mrb[2].mxu1 }
  0xe0   :  { %v499_v29 = vpack.c.bf16 %v121_v21, %v121_v21  ;;  %v503_v30 = vpack.c.bf16 %v137_v22, %v137_v22  ;;  %v124_v31 = vadd.f32 %v546_v27, %v452_v18  ;;  %v140_v32 = vadd.f32 %v550_v28, %v452_v18  ;;  %v115_v33 = vpop.f32.mrb[3].mxu0  ;;  %v131_v34 = vpop.f32.mrb[3].mxu1 }
  0xe1   :  { %v497_v35 = vpack.c.bf16 %v113_v25, %v113_v25  ;;  %v501_v36 = vpack.c.bf16 %v129_v26, %v129_v26  ;;  %v116_v37 = vadd.f32 %v452_v18, %v115_v33  ;;  %v132_v38 = vadd.f32 %v452_v18, %v131_v34 }
  0xe2   :  { %354 = vst.msk [vmem:[%s799_s7 + $0x8] sm:$0xf] %vm351_vm1, %v499_v29  ;;  %358 = vst.msk [vmem:[%s799_s7 + $0x18] sm:$0xf] %vm351_vm1, %v503_v30  ;;  %v500_v39 = vpack.c.bf16 %v124_v31, %v124_v31  ;;  %v504_v40 = vpack.c.bf16 %v140_v32, %v140_v32 }
  0xe3   :  { %352 = vst.msk [vmem:[%s799_s7] sm:$0xf] %vm351_vm1, %v497_v35  ;;  %356 = vst.msk [vmem:[%s799_s7 + $0x10] sm:$0xf] %vm351_vm1, %v501_v36  ;;  %v498_v41 = vpack.c.bf16 %v116_v37, %v116_v37  ;;  %v502_v42 = vpack.c.bf16 %v132_v38, %v132_v38 }
  0xe4   :  { %355 = vst.msk [vmem:[%s799_s7 + $0xc] sm:$0xf] %vm351_vm1, %v500_v39  ;;  %359 = vst.msk [vmem:[%s799_s7 + $0x1c] sm:$0xf] %vm351_vm1, %v504_v40 }
  0xe5   :  { %353 = vst.msk [vmem:[%s799_s7 + $0x4] sm:$0xf] %vm351_vm1, %v498_v41  ;;  %357 = vst.msk [vmem:[%s799_s7 + $0x14] sm:$0xf] %vm351_vm1, %v502_v42  ;;  %v557_v45 = vpop.f32.mrb[4].mxu1  ;;  %v569_v46 = vpop.f32.mrb[4].mxu0 }
  0xe6   :  { %v209_v47 = vadd.f32 %v557_v45, %v459_v43  ;;  %v297_v48 = vadd.f32 %v569_v46, %v466_v44  ;;  %v200_v49 = vpop.f32.mrb[5].mxu1  ;;  %v288_v50 = vpop.f32.mrb[5].mxu0 }
  0xe7   :  { %v201_v51 = vadd.f32 %v459_v43, %v200_v49  ;;  %v289_v52 = vadd.f32 %v466_v44, %v288_v50  ;;  %v558_v53 = vpop.f32.mrb[6].mxu1  ;;  %v570_v54 = vpop.f32.mrb[6].mxu0 }
  0xe8   :  { %v507_v55 = vpack.c.bf16 %v209_v47, %v209_v47  ;;  %v515_v56 = vpack.c.bf16 %v297_v48, %v297_v48  ;;  %v212_v57 = vadd.f32 %v558_v53, %v459_v43  ;;  %v300_v58 = vadd.f32 %v570_v54, %v466_v44  ;;  %v203_v59 = vpop.f32.mrb[7].mxu1  ;;  %v291_v60 = vpop.f32.mrb[7].mxu0 }
  0xe9   :  { %v505_v61 = vpack.c.bf16 %v201_v51, %v201_v51  ;;  %v513_v62 = vpack.c.bf16 %v289_v52, %v289_v52  ;;  %v204_v63 = vadd.f32 %v459_v43, %v203_v59  ;;  %v292_v0 = vadd.f32 %v466_v44, %v291_v60 }
  0xea   :  { %394 = vst.msk [vmem:[%s802_s8 + $0x8] sm:$0xf] %vm351_vm1, %v507_v55  ;;  %434 = vst.msk [vmem:[%s803_s9 + $0x8] sm:$0xf] %vm351_vm1, %v515_v56  ;;  %v508_v1 = vpack.c.bf16 %v212_v57, %v212_v57  ;;  %v516_v2 = vpack.c.bf16 %v300_v58, %v300_v58 }
  0xeb   :  { %392 = vst.msk [vmem:[%s802_s8] sm:$0xf] %vm351_vm1, %v505_v61  ;;  %432 = vst.msk [vmem:[%s803_s9] sm:$0xf] %vm351_vm1, %v513_v62  ;;  %v506_v3 = vpack.c.bf16 %v204_v63, %v204_v63  ;;  %v514_v4 = vpack.c.bf16 %v292_v0, %v292_v0 }
  0xec   :  { %395 = vst.msk [vmem:[%s802_s8 + $0xc] sm:$0xf] %vm351_vm1, %v508_v1  ;;  %435 = vst.msk [vmem:[%s803_s9 + $0xc] sm:$0xf] %vm351_vm1, %v516_v2 }
  0xed   :  { %393 = vst.msk [vmem:[%s802_s8 + $0x4] sm:$0xf] %vm351_vm1, %v506_v3  ;;  %433 = vst.msk [vmem:[%s803_s9 + $0x4] sm:$0xf] %vm351_vm1, %v514_v4  ;;  %v561_v5 = vpop.f32.mrb[8].mxu1  ;;  %v573_v6 = vpop.f32.mrb[8].mxu0 }
  0xee   :  { %v225_v7 = vadd.f32 %v561_v5, %v459_v43  ;;  %v313_v8 = vadd.f32 %v573_v6, %v466_v44  ;;  %v216_v9 = vpop.f32.mrb[9].mxu1  ;;  %v304_v10 = vpop.f32.mrb[9].mxu0 }
  0xef   :  { %v217_v11 = vadd.f32 %v459_v43, %v216_v9  ;;  %v305_v12 = vadd.f32 %v466_v44, %v304_v10  ;;  %v562_v13 = vpop.f32.mrb[10].mxu1  ;;  %v574_v14 = vpop.f32.mrb[10].mxu0 }
  0xf0   :  { %v511_v15 = vpack.c.bf16 %v225_v7, %v225_v7  ;;  %v519_v16 = vpack.c.bf16 %v313_v8, %v313_v8  ;;  %v228_v17 = vadd.f32 %v562_v13, %v459_v43  ;;  %v316_v18 = vadd.f32 %v574_v14, %v466_v44  ;;  %v219_v19 = vpop.f32.mrb[11].mxu1  ;;  %v307_v20 = vpop.f32.mrb[11].mxu0 }
  0xf1   :  { %v509_v21 = vpack.c.bf16 %v217_v11, %v217_v11  ;;  %v517_v22 = vpack.c.bf16 %v305_v12, %v305_v12  ;;  %v220_v23 = vadd.f32 %v459_v43, %v219_v19  ;;  %v308_v24 = vadd.f32 %v466_v44, %v307_v20 }
  0xf2   :  { %398 = vst.msk [vmem:[%s802_s8 + $0x18] sm:$0xf] %vm351_vm1, %v511_v15  ;;  %438 = vst.msk [vmem:[%s803_s9 + $0x18] sm:$0xf] %vm351_vm1, %v519_v16  ;;  %v512_v25 = vpack.c.bf16 %v228_v17, %v228_v17  ;;  %v520_v26 = vpack.c.bf16 %v316_v18, %v316_v18 }
  0xf3   :  { %396 = vst.msk [vmem:[%s802_s8 + $0x10] sm:$0xf] %vm351_vm1, %v509_v21  ;;  %436 = vst.msk [vmem:[%s803_s9 + $0x10] sm:$0xf] %vm351_vm1, %v517_v22  ;;  %v510_v27 = vpack.c.bf16 %v220_v23, %v220_v23  ;;  %v518_v28 = vpack.c.bf16 %v308_v24, %v308_v24 }
  0xf4   :  { %399 = vst.msk [vmem:[%s802_s8 + $0x1c] sm:$0xf] %vm351_vm1, %v512_v25  ;;  %439 = vst.msk [vmem:[%s803_s9 + $0x1c] sm:$0xf] %vm351_vm1, %v520_v26 }
  0xf5   :  { %397 = vst.msk [vmem:[%s802_s8 + $0x14] sm:$0xf] %vm351_vm1, %v510_v27  ;;  %437 = vst.msk [vmem:[%s803_s9 + $0x14] sm:$0xf] %vm351_vm1, %v518_v28 }

</bundles_post_ra>
